<compile_context>
chip_gen: v7x
topology: tpu7x:2x2x1
jax: 0.10.0
libtpu: 0.0.40
codegen_flags: <defaults>
</compile_context>

<pallas_src>
import math
import functools

import jax
import jax.numpy as jnp
from jax.experimental import pallas as pl
from jax.experimental.pallas import tpu as pltpu


def _round_up(x, m):
    return ((x + m - 1) // m) * m


def _block_spec(shape, index_map, buffers=None):
    """BlockSpec with optional explicit buffer count (default pipeline is 2)."""
    if buffers is not None and buffers != 2 and hasattr(pl, "Buffered"):
        return pl.BlockSpec(shape, index_map, pipeline_mode=pl.Buffered(buffers))
    return pl.BlockSpec(shape, index_map)


def _physical_vmem_bytes():
    try:
        info = pltpu.get_tpu_info()
        cap = getattr(info, "vmem_capacity_bytes", None)
        if cap:
            return int(cap)
    except Exception:
        pass
    return 128 * 1024 * 1024  # conservative default (v5e/v6e)


def _lm_head_kernel(x_ref, w1_ref, b1_ref, g_ref, beta_ref,
                    w2_ref, b2_ref, out_ref, t_scratch, *, eps):
    """Grid: (M tiles [parallel], V tiles [arbitrary])."""

    @pl.when(pl.program_id(1) == 0)
    def _():
        # Dense (f32 accumulation even for bf16 inputs).
        h = jnp.dot(x_ref[...], w1_ref[...],
                    preferred_element_type=jnp.float32)
        h = h + b1_ref[...].astype(jnp.float32)
        # Exact (erf-based) GELU, matching transformers' 'gelu'.
        h = 0.5 * h * (1.0 + jax.lax.erf(h * (1.0 / math.sqrt(2.0))))
        # LayerNorm over the hidden (last) axis, in f32.
        mu = jnp.mean(h, axis=-1, keepdims=True)
        var = jnp.mean(jnp.square(h - mu), axis=-1, keepdims=True)
        h = (h - mu) * jax.lax.rsqrt(var + eps)
        h = h * g_ref[...].astype(jnp.float32) + beta_ref[...].astype(jnp.float32)
        # If W2 is bf16, the transform is stored bf16 (native MXU decoder pass).
        t_scratch[...] = h.astype(t_scratch.dtype)

    # Decoder matmul for this vocab tile (f32 accumulation).
    out_ref[...] = (
        jnp.dot(t_scratch[...], w2_ref[...], preferred_element_type=jnp.float32)
        + b2_ref[...].astype(jnp.float32)
    ).astype(out_ref.dtype)


def prepare_lm_head_params(params, *, tv=1024, weight_dtype=None):
    """One-time preprocessing (call once at init, NOT per forward step).

    - reshapes 1-D vectors to (1, N)
    - pads the vocab dim of w2/bias to a multiple of the vocab tile (avoids a
      per-call jnp.pad copy of the decoder weight)
    - optionally casts the decoder weight/bias to `weight_dtype` (e.g. bf16)
      to halve the dominant HBM stream.

    Returns (prepared_params, vocab_size).
    """
    w1 = params["w1"]
    b1 = jnp.reshape(params["b1"], (1, -1))
    gamma = jnp.reshape(params["gamma"], (1, -1))
    beta = jnp.reshape(params["beta"], (1, -1))
    w2 = params["w2"]
    bias = jnp.reshape(params["bias"], (1, -1))

    V = w2.shape[1]
    tv_eff = min(tv, _round_up(V, 128))
    V_pad = _round_up(V, tv_eff)
    if V_pad != V:
        w2 = jnp.pad(w2, ((0, 0), (0, V_pad - V)))
        bias = jnp.pad(bias, ((0, 0), (0, V_pad - V)))
    if weight_dtype is not None:
        w2 = w2.astype(weight_dtype)
        bias = bias.astype(weight_dtype)

    prepared = {"w1": w1, "b1": b1, "gamma": gamma, "beta": beta,
                "w2": w2, "bias": bias}
    return prepared, V


def bert_lm_prediction_head(hidden_states, params, *, vocab_size=None,
                            eps=1e-12, tm=512, tv=1024,
                            out_dtype=jnp.float32, w2_buffers=2,
                            slice_output=True):
    """hidden_states: [B, S, H] -> logits [B, S, V] (or [B, S, V_pad])."""
    B, S, H = hidden_states.shape
    M = B * S

    w1 = params["w1"]          # [H, H]   (in, out)
    b1 = params["b1"]          # [1, H]
    gamma = params["gamma"]    # [1, H]
    beta = params["beta"]      # [1, H]
    w2 = params["w2"]          # [H, V_stored]  (in, out)
    bias = params["bias"]      # [1, V_stored]

    V_stored = w2.shape[1]
    V = V_stored if vocab_size is None else vocab_size

    # --- M (token) tiling: keep (8,128) alignment, guarantee >=2 tiles so the
    # "parallel" axis can shard over both v7x TensorCores even for tiny M.
    tm_eff = min(tm, _round_up(M, 8))
    if (_round_up(M, tm_eff) // tm_eff) < 2 and M > 8:
        tm_eff = _round_up((M + 1) // 2, 8)
    M_pad = _round_up(M, tm_eff)

    # --- V (vocab) tiling.
    tv_eff = min(tv, _round_up(V_stored, 128))
    V_pad = _round_up(V_stored, tv_eff)
    if V_pad != V_stored:
        # Fallback for un-prepared params: per-call pad (extra copy). Prefer
        # prepare_lm_head_params() so this never triggers in steady state.
        w2 = jnp.pad(w2, ((0, 0), (0, V_pad - V_stored)))
        bias = jnp.pad(bias, ((0, 0), (0, V_pad - V_stored)))

    x = hidden_states.reshape(M, H)
    if M_pad != M:
        x = jnp.pad(x, ((0, M_pad - M), (0, 0)))

    # --- VMEM budget for the chosen tiles.
    def nbytes(shape, dtype):
        return math.prod(shape) * jnp.dtype(dtype).itemsize

    single_buffer_consts = hasattr(pl, "Buffered")
    const_bufs = 1 if single_buffer_consts else 2
    vmem_estimate = (
        2 * nbytes((tm_eff, H), x.dtype)                 # x tile (double-buffered)
        + const_bufs * nbytes((H, H), w1.dtype)          # W1 (grid-constant)
        + 3 * const_bufs * nbytes((1, H), b1.dtype)      # b1 / gamma / beta
        + nbytes((tm_eff, H), w2.dtype)                  # transform scratch
        + max(2, w2_buffers) * nbytes((H, tv_eff), w2.dtype)   # W2 vocab tile
        + 2 * nbytes((1, tv_eff), bias.dtype)            # decoder bias tile
        + 2 * nbytes((tm_eff, tv_eff), out_dtype)        # output tile
    )
    vmem_cap = int(_physical_vmem_bytes() * 0.85)        # headroom for Mosaic scratch
    vmem_limit = min(max(32 * 1024 * 1024, int(vmem_estimate * 1.5)), vmem_cap)

    kernel = functools.partial(_lm_head_kernel, eps=eps)

    logits = pl.pallas_call(
        kernel,
        out_shape=jax.ShapeDtypeStruct((M_pad, V_pad), out_dtype),
        grid_spec=pltpu.PrefetchScalarGridSpec(
            num_scalar_prefetch=0,
            grid=(M_pad // tm_eff, V_pad // tv_eff),
            in_specs=[
                pl.BlockSpec((tm_eff, H), lambda i, j: (i, 0)),          # x row tile
                _block_spec((H, H), lambda i, j: (0, 0), buffers=1),     # W1 (constant)
                _block_spec((1, H), lambda i, j: (0, 0), buffers=1),     # b1
                _block_spec((1, H), lambda i, j: (0, 0), buffers=1),     # LN gamma
                _block_spec((1, H), lambda i, j: (0, 0), buffers=1),     # LN beta
                _block_spec((H, tv_eff), lambda i, j: (0, j),
                            buffers=w2_buffers),                         # W2 vocab tile
                pl.BlockSpec((1, tv_eff), lambda i, j: (0, j)),          # decoder bias
            ],
            out_specs=pl.BlockSpec((tm_eff, tv_eff), lambda i, j: (i, j)),
            # Scratch matches W2's dtype: bf16 W2 -> bf16 x bf16 MXU decoder
            # pass with f32 accumulation.
            scratch_shapes=[pltpu.VMEM((tm_eff, H), w2.dtype)],
        ),
        compiler_params=pltpu.CompilerParams(
            # M tiles independent -> shard across TensorCores; vocab axis
            # carries the transform scratch -> arbitrary (serial).
            dimension_semantics=("parallel", "arbitrary"),
            vmem_limit_bytes=vmem_limit,
        ),
    )(x, w1, b1, gamma, beta, w2, bias)

    if M_pad != M:
        logits = logits[:M]
    if slice_output and V_pad != V:
        return logits[:, :V].reshape(B, S, V)
    return logits.reshape(B, S, logits.shape[-1])


def _reference(hidden_states, params, eps=1e-12):
    x = hidden_states.astype(jnp.float32).reshape(-1, hidden_states.shape[-1])
    w1 = params["w1"].astype(jnp.float32)
    b1 = params["b1"].astype(jnp.float32).reshape(1, -1)
    g = params["gamma"].astype(jnp.float32).reshape(1, -1)
    bt = params["beta"].astype(jnp.float32).reshape(1, -1)
    w2 = params["w2"].astype(jnp.float32)
    b2 = params["bias"].astype(jnp.float32).reshape(1, -1)
    h = x @ w1 + b1
    h = 0.5 * h * (1.0 + jax.lax.erf(h / jnp.sqrt(2.0)))
    mu = jnp.mean(h, axis=-1, keepdims=True)
    var = jnp.mean((h - mu) ** 2, axis=-1, keepdims=True)
    h = (h - mu) / jnp.sqrt(var + eps)
    h = h * g + bt
    return h @ w2 + b2


if __name__ == "__main__":
    key = jax.random.PRNGKey(0)
    k_x, k_w1, k_b1, k_g, k_bt, k_w2 = jax.random.split(key, 6)

    # ---- Test 1: f32 path, small config (hidden=128, vocab=512) ----------
    B, S, H, V = 2, 8, 128, 512
    hidden_states = jax.random.normal(k_x, (B, S, H), dtype=jnp.float32)
    raw_params = {
        "w1": jax.random.normal(k_w1, (H, H), dtype=jnp.float32) * 0.02,
        "b1": jax.random.normal(k_b1, (H,), dtype=jnp.float32) * 0.02,
        "gamma": 1.0 + 0.1 * jax.random.normal(k_g, (H,), dtype=jnp.float32),
        "beta": 0.1 * jax.random.normal(k_bt, (H,), dtype=jnp.float32),
        "w2": jax.random.normal(k_w2, (H, V), dtype=jnp.float32) * 0.02,
        "bias": 0.01 * jax.random.normal(k_b1, (V,), dtype=jnp.float32),
    }
    params1, vocab1 = prepare_lm_head_params(raw_params, tv=1024, weight_dtype=None)

    logits = bert_lm_prediction_head(hidden_states, params1, vocab_size=vocab1)
    logits = jax.block_until_ready(logits)
    ref = _reference(hidden_states, raw_params).reshape(B, S, V)
    assert logits.shape == (B, S, V)
    assert jnp.allclose(logits, ref, atol=1e-4, rtol=1e-4), \
        float(jnp.max(jnp.abs(logits - ref)))

    # ---- Test 2: bf16 weights/activations, non-multiple vocab & M --------
    # Exercises padding (M=15, V=1000), bf16 decoder-weight streaming, bf16
    # transform scratch, bf16 logits output and the >=2-M-tile small-M path.
    B2, S2, V2 = 3, 5, 1000
    hs2 = jax.random.normal(k_x, (B2, S2, H), dtype=jnp.float32)
    raw2 = dict(raw_params)
    raw2["w2"] = jax.random.normal(k_w2, (H, V2), dtype=jnp.float32) * 0.02
    raw2["bias"] = jnp.zeros((V2,), dtype=jnp.float32)
    raw2 = {k: v.astype(jnp.bfloat16) for k, v in raw2.items()}
    params2, vocab2 = prepare_lm_head_params(raw2, tv=1024,
                                             weight_dtype=jnp.bfloat16)

    logits2 = bert_lm_prediction_head(hs2.astype(jnp.bfloat16), params2,
                                      vocab_size=vocab2,
                                      out_dtype=jnp.bfloat16)
    logits2 = jax.block_until_ready(logits2)
    ref2 = _reference(hs2.astype(jnp.bfloat16), raw2).reshape(B2, S2, V2)
    assert logits2.shape == (B2, S2, V2)
    assert bool(jnp.all(jnp.isfinite(logits2.astype(jnp.float32))))
    assert jnp.allclose(logits2.astype(jnp.float32), ref2,
                        atol=5e-2, rtol=5e-2), \
        float(jnp.max(jnp.abs(logits2.astype(jnp.float32) - ref2)))

    print("KERNEL_OK")
</pallas_src>

<mosaic_0001>
module attributes {stable_mosaic.version = 11 : i64} {
  func.func @_lm_head_kernel(%arg0: i32, %arg1: i32, %arg2: memref<8x128xf32, #tpu.memory_space<vmem>>, %arg3: memref<128x128xf32, #tpu.memory_space<vmem>>, %arg4: memref<1x128xf32, #tpu.memory_space<vmem>>, %arg5: memref<1x128xf32, #tpu.memory_space<vmem>>, %arg6: memref<1x128xf32, #tpu.memory_space<vmem>>, %arg7: memref<128x512xf32, #tpu.memory_space<vmem>>, %arg8: memref<1x512xf32, #tpu.memory_space<vmem>>, %arg9: memref<8x512xf32, #tpu.memory_space<vmem>>, %arg10: memref<8x128xf32, #tpu.memory_space<vmem>>) attributes {dimension_semantics = [#tpu.dimension_semantics<parallel>, #tpu.dimension_semantics<arbitrary>], iteration_bounds = array<i64: 2, 1>, scalar_prefetch = 0 : i64, scratch_operands = 1 : i64, tpu.core_type = #tpu.core_type<tc>, window_params = [{transform_indices = @transform_0, window_bounds = array<i64: 8, 128>}, {pipeline_mode = #tpu.pipeline_mode<synchronous>, transform_indices = @transform_1, window_bounds = array<i64: 128, 128>}, {pipeline_mode = #tpu.pipeline_mode<synchronous>, transform_indices = @transform_2, window_bounds = array<i64: 1, 128>}, {pipeline_mode = #tpu.pipeline_mode<synchronous>, transform_indices = @transform_3, window_bounds = array<i64: 1, 128>}, {pipeline_mode = #tpu.pipeline_mode<synchronous>, transform_indices = @transform_4, window_bounds = array<i64: 1, 128>}, {transform_indices = @transform_5, window_bounds = array<i64: 128, 512>}, {transform_indices = @transform_6, window_bounds = array<i64: 1, 512>}, {transform_indices = @transform_7, window_bounds = array<i64: 8, 512>}]} {
    %c0_i32 = arith.constant 0 : i32
    %0 = arith.cmpi eq, %arg1, %c0_i32 : i32
    %1 = arith.extui %0 : i1 to i32
    %c0_i32_0 = arith.constant 0 : i32
    %2 = arith.cmpi ne, %1, %c0_i32_0 : i32
    scf.if %2 {
      %c0_8 = arith.constant 0 : index
      %c0_9 = arith.constant 0 : index
      %10 = vector.load %arg2[%c0_8, %c0_9] : memref<8x128xf32, #tpu.memory_space<vmem>>, vector<8x128xf32>
      %c0_10 = arith.constant 0 : index
      %c0_11 = arith.constant 0 : index
      %11 = vector.load %arg3[%c0_10, %c0_11] : memref<128x128xf32, #tpu.memory_space<vmem>>, vector<128x128xf32>
      %cst_12 = arith.constant dense<0.000000e+00> : vector<8x128xf32>
      %12 = tpu.matmul %10, %11, %cst_12 {dimension_numbers = #tpu.dot_dimension_numbers<[1], [0], [0], [1], [0, 0, 1, 1], [], []>} : vector<8x128xf32>, vector<128x128xf32>, vector<8x128xf32> -> vector<8x128xf32>
      %c0_13 = arith.constant 0 : index
      %c0_14 = arith.constant 0 : index
      %13 = vector.load %arg4[%c0_13, %c0_14] : memref<1x128xf32, #tpu.memory_space<vmem>>, vector<1x128xf32>
      %14 = vector.broadcast %13 : vector<1x128xf32> to vector<8x128xf32>
      %15 = arith.addf %12, %14 : vector<8x128xf32>
      %cst_15 = arith.constant 5.000000e-01 : f32
      %16 = vector.broadcast %cst_15 : f32 to vector<8x128xf32>
      %17 = arith.mulf %16, %15 : vector<8x128xf32>
      %cst_16 = arith.constant 0.707106769 : f32
      %18 = vector.broadcast %cst_16 : f32 to vector<8x128xf32>
      %19 = arith.mulf %15, %18 : vector<8x128xf32>
      %20 = math.erf %19 : vector<8x128xf32>
      %cst_17 = arith.constant 1.000000e+00 : f32
      %21 = vector.broadcast %cst_17 : f32 to vector<8x128xf32>
      %22 = arith.addf %21, %20 : vector<8x128xf32>
      %23 = arith.mulf %17, %22 : vector<8x128xf32>
      %cst_18 = arith.constant dense<0.000000e+00> : vector<8xf32>
      %24 = vector.multi_reduction <add>, %23, %cst_18 [1] : vector<8x128xf32> to vector<8xf32>
      %25 = vector.shape_cast %24 : vector<8xf32> to vector<8x1xf32>
      %cst_19 = arith.constant 1.280000e+02 : f32
      %26 = vector.broadcast %cst_19 : f32 to vector<8x1xf32>
      %27 = arith.divf %25, %26 : vector<8x1xf32>
      %28 = vector.broadcast %27 : vector<8x1xf32> to vector<8x128xf32>
      %29 = arith.subf %23, %28 : vector<8x128xf32>
      %30 = arith.mulf %29, %29 : vector<8x128xf32>
      %cst_20 = arith.constant dense<0.000000e+00> : vector<8xf32>
      %31 = vector.multi_reduction <add>, %30, %cst_20 [1] : vector<8x128xf32> to vector<8xf32>
      %32 = vector.shape_cast %31 : vector<8xf32> to vector<8x1xf32>
      %cst_21 = arith.constant 1.280000e+02 : f32
      %33 = vector.broadcast %cst_21 : f32 to vector<8x1xf32>
      %34 = arith.divf %32, %33 : vector<8x1xf32>
      %35 = vector.broadcast %27 : vector<8x1xf32> to vector<8x128xf32>
      %36 = arith.subf %23, %35 : vector<8x128xf32>
      %cst_22 = arith.constant 9.99999996E-13 : f32
      %37 = vector.broadcast %cst_22 : f32 to vector<8x1xf32>
      %38 = arith.addf %34, %37 : vector<8x1xf32>
      %39 = math.rsqrt %38 : vector<8x1xf32>
      %40 = vector.broadcast %39 : vector<8x1xf32> to vector<8x128xf32>
      %41 = arith.mulf %36, %40 : vector<8x128xf32>
      %c0_23 = arith.constant 0 : index
      %c0_24 = arith.constant 0 : index
      %42 = vector.load %arg5[%c0_23, %c0_24] : memref<1x128xf32, #tpu.memory_space<vmem>>, vector<1x128xf32>
      %43 = vector.broadcast %42 : vector<1x128xf32> to vector<8x128xf32>
      %44 = arith.mulf %41, %43 : vector<8x128xf32>
      %c0_25 = arith.constant 0 : index
      %c0_26 = arith.constant 0 : index
      %45 = vector.load %arg6[%c0_25, %c0_26] : memref<1x128xf32, #tpu.memory_space<vmem>>, vector<1x128xf32>
      %46 = vector.broadcast %45 : vector<1x128xf32> to vector<8x128xf32>
      %47 = arith.addf %44, %46 : vector<8x128xf32>
      %c0_27 = arith.constant 0 : index
      %c0_28 = arith.constant 0 : index
      %48 = vector.load %arg10[%c0_27, %c0_28] : memref<8x128xf32, #tpu.memory_space<vmem>>, vector<8x128xf32>
      tpu.vector_store %arg10[%c0_27, %c0_28], %47 {strides = array<i32>} : memref<8x128xf32, #tpu.memory_space<vmem>>, vector<8x128xf32>,
    } else {
    }
    %c0 = arith.constant 0 : index
    %c0_1 = arith.constant 0 : index
    %3 = vector.load %arg10[%c0, %c0_1] : memref<8x128xf32, #tpu.memory_space<vmem>>, vector<8x128xf32>
    %c0_2 = arith.constant 0 : index
    %c0_3 = arith.constant 0 : index
    %4 = vector.load %arg7[%c0_2, %c0_3] : memref<128x512xf32, #tpu.memory_space<vmem>>, vector<128x512xf32>
    %cst = arith.constant dense<0.000000e+00> : vector<8x512xf32>
    %5 = tpu.matmul %3, %4, %cst {dimension_numbers = #tpu.dot_dimension_numbers<[1], [0], [0], [1], [0, 0, 1, 1], [], []>} : vector<8x128xf32>, vector<128x512xf32>, vector<8x512xf32> -> vector<8x512xf32>
    %c0_4 = arith.constant 0 : index
    %c0_5 = arith.constant 0 : index
    %6 = vector.load %arg8[%c0_4, %c0_5] : memref<1x512xf32, #tpu.memory_space<vmem>>, vector<1x512xf32>
    %7 = vector.broadcast %6 : vector<1x512xf32> to vector<8x512xf32>
    %8 = arith.addf %5, %7 : vector<8x512xf32>
    %c0_6 = arith.constant 0 : index
    %c0_7 = arith.constant 0 : index
    %9 = vector.load %arg9[%c0_6, %c0_7] : memref<8x512xf32, #tpu.memory_space<vmem>>, vector<8x512xf32>
    tpu.vector_store %arg9[%c0_6, %c0_7], %8 {strides = array<i32>} : memref<8x512xf32, #tpu.memory_space<vmem>>, vector<8x512xf32>,
    return
  }
  func.func @transform_0(%arg0: i32, %arg1: i32) -> (i32, i32) {
    %c0_i32 = arith.constant 0 : i32
    %c0_i32_0 = arith.constant 0 : i32
    return %arg0, %c0_i32 : i32, i32
  }
  func.func @transform_1(%arg0: i32, %arg1: i32) -> (i32, i32) {
    %c0_i32 = arith.constant 0 : i32
    %c0_i32_0 = arith.constant 0 : i32
    %c0_i32_1 = arith.constant 0 : i32
    return %c0_i32, %c0_i32_0 : i32, i32
  }
  func.func @transform_2(%arg0: i32, %arg1: i32) -> (i32, i32) {
    %c0_i32 = arith.constant 0 : i32
    %c0_i32_0 = arith.constant 0 : i32
    %c0_i32_1 = arith.constant 0 : i32
    return %c0_i32, %c0_i32_0 : i32, i32
  }
  func.func @transform_3(%arg0: i32, %arg1: i32) -> (i32, i32) {
    %c0_i32 = arith.constant 0 : i32
    %c0_i32_0 = arith.constant 0 : i32
    %c0_i32_1 = arith.constant 0 : i32
    return %c0_i32, %c0_i32_0 : i32, i32
  }
  func.func @transform_4(%arg0: i32, %arg1: i32) -> (i32, i32) {
    %c0_i32 = arith.constant 0 : i32
    %c0_i32_0 = arith.constant 0 : i32
    %c0_i32_1 = arith.constant 0 : i32
    return %c0_i32, %c0_i32_0 : i32, i32
  }
  func.func @transform_5(%arg0: i32, %arg1: i32) -> (i32, i32) {
    %c0_i32 = arith.constant 0 : i32
    %c0_i32_0 = arith.constant 0 : i32
    return %c0_i32, %arg1 : i32, i32
  }
  func.func @transform_6(%arg0: i32, %arg1: i32) -> (i32, i32) {
    %c0_i32 = arith.constant 0 : i32
    %c0_i32_0 = arith.constant 0 : i32
    return %c0_i32, %arg1 : i32, i32
  }
  func.func @transform_7(%arg0: i32, %arg1: i32) -> (i32, i32) {
    %c0_i32 = arith.constant 0 : i32
    return %arg0, %arg1 : i32, i32
  }
}

</mosaic_0001>

<bundles_post_ra>
// kernel: tpu_custom_call.1
= control target key start
LH: loop header
LB: loop body
LE: loop exit
PB: predicated region body
PF: predicated region fallthrough
CT: control target
= control target key end

     0   :  { %12 = vsyncpa [#allocation4], 0  ;;  %s1615_s0 = inlined_call_operand.hbm [shape: f32[16,128], index: 0, kind: input, shape index: {}]   ;;  %s1616_s1 = inlined_call_operand.hbm [shape: f32[128,128], index: 1, kind: input, shape index: {}]   ;;  %s1617_s2 = inlined_call_operand.vmem [shape: f32[1,128], index: 2, kind: input, shape index: {}]   ;;  %s1618_s3 = inlined_call_operand.vmem [shape: f32[1,128], index: 3, kind: input, shape index: {}]   ;;  %s1619_s4 = inlined_call_operand.vmem [shape: f32[1,128], index: 4, kind: input, shape index: {}]   ;;  %s1620_s5 = inlined_call_operand.hbm [shape: f32[128,512], index: 5, kind: input, shape index: {}]   ;;  %s1621_s6 = inlined_call_operand.vmem [shape: f32[1,512], index: 6, kind: input, shape index: {}]   ;;  %s1622_s7 = inlined_call_operand.hbm [shape: f32[16,512], index: 7, kind: output, shape index: {}]  }
   0x1   :  { %14 = vsyncpa [#allocation4 + $0x1], 0 }
   0x2   :  { %15 = vsyncpa [#allocation7], 0 }
   0x3   :  { %16 = vsyncpa [#allocation5], 0 }
   0x4   :  { %18 = vsyncpa [#allocation5 + $0x1], 0  ;;  %s1344_s24 = smov 0   ;;  %s1346_s25 = smov 0  }
   0x5   :  { %s1348_s26 = smov 0   ;;  %s1350_s27 = smov 0  }
   0x6   :  { %s1352_s28 = smov 0   ;;  %s1354_s29 = smov 0  }
   0x7 LB: > { %1629 = sst [smem:[#allocation13_spill]] %s1271_s24  ;;  %s862_s30 = sadd.s32 4294967295, %s1291_s29   ;;  %s1291_s29 = sphi %s1354_s29, %s24_s29   ;;  %s1287_s28 = sphi %s1352_s28, %s1650_s28   ;;  %s1283_s27 = sphi %s1350_s27, %s1649_s27   ;;  %s1279_s26 = sphi %s1348_s26, %s1648_s26   ;;  %s1275_s25 = sphi %s1346_s25, %s1647_s25   ;;  %s1271_s24 = sphi %s1344_s24, %s1646_s24  }
   0x8   : > { %s863_s8 = sadd.s32 4294967294, %s1291_s29   ;;  %p56_p0 = scmp.ne.s32.totalorder %s1275_s25, %s1271_s24 }
   0x9   : > { %p1378_p1 = scmp.eq.s32.totalorder %s862_s30, 0  ;;  %p1382_p2 = scmp.eq.s32.totalorder %s862_s30, 1 }
   0xa   : > { %p224_p3 = scmp.eq.s32.totalorder %s863_s8, 1  ;;  %p864_p5 = scmp.ge.s32.totalorder %s1291_s29, 1 }
   0xb   : > { %s1630_s9 = scalar_select %p1378_p1, 1, 0 }
   0xc   : > { %p1388_p4 = por %p1378_p1, %p56_p0  ;;  %p1393_p6 = por %p224_p3, %p56_p0 }
   0xd   : > { %p231_p7 = scmp.lt.s32.totalorder %s1291_s29, 3  ;;  %s1293_s14 = smov [#allocation6]  }
   0xe   : > { %s1632_s11 = scalar_select %p1388_p4, 1, 0 }
   0xf   : > { %s1633_s12 = scalar_select %p1393_p6, 1, 0 }
  0x10   : > { %p1398_p8 = pnand %p864_p5, %p231_p7  ;;  %s243_s15 = sshll.u32 %s1293_s14, 4  ;;  %s1402_s15 = int_to_ptr.vmem [resolvable:$true] %s243_s15 }
  0x11   : > { %1634 = sst [smem:[#allocation14_spill]] %s1633_s12  ;;  %s1294_s17 = smov [#allocation8]  }
  0x12   : > { %p1037_p9 = pneg %p1398_p8  ;;  %s268_s18 = sshll.u32 %s1294_s17, 4  ;;  %s1413_s18 = int_to_ptr.vmem [resolvable:$true] %s268_s18 }
  0x13   : > { %s1119_s21 = scalar_lea.hbm %s1616_s1, 2048 }
  0x14   : > { %p1409_p11 = pnand %p1037_p9, %p1378_p1  ;;  %p1120_p12 = scmp.ne.s32.totalorder %s1616_s1, %s1119_s21 }
  0x15   : > { %p1126_p5 = scmp.lt.u32.totalorder %s1119_s21, %s1616_s1 }
  0x16   : > { %p1121_p13 = pneg %p1409_p11 }
  0x18   : > { %p1122_p0 = pnand %p1121_p13, %p1120_p12 }
  0x1a   : > { %p1123_p3 = pneg %p1122_p0 }
  0x1c   : > { %p1128_p7 = pnand %p1126_p5, %p1123_p3 }
  0x1e   : > { %1131 = shalt.err (!%p1128_p7)
}
  0x1f   : > { %s1132_s14 = scalar_lea.vmem %s1402_s15, 2048  ;;  %p1140_p1 = scmp.lt.s32.totalorder %s1402_s15, %s1402_s15 }
  0x20   : > { %p1133_p9 = scmp.ne.s32.totalorder %s1402_s15, %s1132_s14  ;;  %p1141_p12 = scmp.lt.s32.totalorder %s1132_s14, %s1132_s14 }
  0x22   : > { %p1135_p10 = pnand %p1133_p9, %p1121_p13  ;;  %p1142_p0 = por %p1141_p12, %p1140_p1 }
  0x24   : > { %p1136_p6 = pneg %p1135_p10 }
  0x26   : > { %p1143_p4 = pnand %p1142_p0, %p1136_p6 }
  0x28   : > { %1146 = shalt.err (!%p1143_p4)
}
  0x29   : > { %s1295_s17 = smov 128   ;;  %s1296_s19 = smov 8  }
  0x2a   : > { %1040 = dma.hbm_to_vmem [thread:$0]  (!%p1409_p11), %s1616_s1, 2048, %s1402_s15, [#allocation7], %s1295_s17, %s1295_s17, %s1296_s19  }
  0x2b   : > { %s1147_s30 = scalar_lea.hbm %s1620_s5, 8192 }
  0x2c   : > { %p1148_p1 = scmp.ne.s32.totalorder %s1620_s5, %s1147_s30  ;;  %p1154_p10 = scmp.lt.u32.totalorder %s1147_s30, %s1620_s5 }
  0x2e   : > { %p1150_p4 = pnand %p1148_p1, %p1121_p13 }
  0x30   : > { %p1151_p6 = pneg %p1150_p4 }
  0x32   : > { %p1156_p3 = pnand %p1154_p10, %p1151_p6 }
  0x34   : > { %1159 = shalt.err (!%p1156_p3)
}
  0x35   : > { %s1160_s15 = scalar_lea.vmem %s1413_s18, 8192  ;;  %p1168_p12 = scmp.lt.s32.totalorder %s1413_s18, %s1413_s18 }
  0x36   : > { %p1161_p5 = scmp.ne.s32.totalorder %s1413_s18, %s1160_s15  ;;  %p1169_p0 = scmp.lt.s32.totalorder %s1160_s15, %s1160_s15 }
  0x38   : > { %p1163_p7 = pnand %p1161_p5, %p1121_p13  ;;  %p1170_p1 = por %p1169_p0, %p1168_p12 }
  0x3a   : > { %p1164_p9 = pneg %p1163_p7 }
  0x3c   : > { %p1171_p4 = pnand %p1170_p1, %p1164_p9 }
  0x3e   : > { %1174 = shalt.err (!%p1171_p4)
}
  0x3f   : > { %s1297_s24 = smov 512   ;;  %s1298_s12 = smov 32  }
  0x40   : > { %1043 = dma.hbm_to_vmem [thread:$0]  (!%p1409_p11), %s1620_s5, 8192, %s1413_s18, [#allocation7], %s1297_s24, %s1297_s24, %s1298_s12  }
  0x41   : > { %s36_s20 = sadd.s32 1, %s1287_s28  ;;  %s43_s21 = sadd.s32 1, %s1279_s26 }
  0x42   : > { %p38_p13 = scmp.ge.s32.totalorder %s36_s20, 2  ;;  %p50_p6 = scmp.ne.s32.totalorder %s1279_s26, %s1275_s25 }
  0x43   : > { %p51_p10 = scmp.eq.s32.totalorder %s1291_s29, 0  ;;  %p1054_p3 = scmp.lt.s32.totalorder %s1291_s29, 2 }
  0x44   : > { %s1652_s20 = smov (%p38_p13, %s36_s20), 0  ;;  %p1477_p7 = por %p1382_p2, %p50_p6 }
  0x45   : > { %p52_p5 = por %p51_p10, %p50_p6  ;;  %s40_s16 = ssub.s32 %s1287_s28, %s1652_s20 }
  0x46   : > { %s1637_s22 = scalar_select %p1477_p7, 1, 0 }
  0x47   : > { %s290_s23 = sand.u32 1, %s1279_s26   ;;  %p41_p9 = scmp.eq.s32.totalorder %s40_s16, 0 }
  0x48   : > { %s869_s18 = sshll.u32 %s290_s23, 3  ;;  %s870_s30 = sshll.u32 %s1287_s28, 7 }
  0x49   : > { %s1486_s8 = scalar_select %p41_p9, %s1279_s26, %s43_s21  }
  0x4a   : > { %s1491_s24 = scalar_lea.hbm %s1615_s0, %s870_s30  ;;  %s294_s10 = scalar_lea.vmem [#allocation3], %s869_s18 }
  0x4b   : > { %s301_s12 = sshll.u32 %s294_s10, 4  ;;  %p1495_p2 = pnand %p1054_p3, %p52_p5  ;;  %s1499_s12 = int_to_ptr.vmem [resolvable:$true] %s301_s12 }
  0x4c   : > { %s291_s19 = scalar_lea.sflag [#allocation4], %s290_s23  ;;  %s1175_s21 = scalar_lea.hbm %s1491_s24, 128 }
  0x4d   : > { %p1176_p11 = scmp.ne.s32.totalorder %s1491_s24, %s1175_s21  ;;  %p1177_p12 = pneg %p1495_p2 }
  0x4e   : > { %s1180_s30 = scalar_lea.hbm %s1615_s0, 256  ;;  %p1181_p4 = scmp.lt.u32.totalorder %s1491_s24, %s1615_s0 }
  0x4f   : > { %p1178_p0 = pnand %p1177_p12, %p1176_p11  ;;  %p1182_p13 = scmp.lt.u32.totalorder %s1180_s30, %s1175_s21 }
  0x50   : > { %p1184_p10 = scmp.lt.u32.totalorder %s1175_s21, %s1491_s24 }
  0x51   : > { %p1179_p1 = pneg %p1178_p0  ;;  %p1183_p6 = por %p1182_p13, %p1181_p4 }
  0x53   : > { %p1185_p3 = por %p1184_p10, %p1183_p6 }
  0x55   : > { %p1186_p5 = pnand %p1185_p3, %p1179_p1 }
  0x57   : > { %1189 = shalt.err (!%p1186_p5)
}
  0x58   : > { %s1190_s23 = scalar_lea.vmem %s1499_s12, 128  ;;  %s1299_s10 = smov [#allocation3]  }
  0x59   : > { %p1191_p9 = scmp.ne.s32.totalorder %s1499_s12, %s1190_s23  ;;  %s1195_s16 = sshll.u32 %s1299_s10, 4  ;;  %s1196_s16 = int_to_ptr.vmem [resolvable:$false] %s1195_s16 }
  0x5a   : > { %s1197_s18 = scalar_lea.vmem %s1196_s16, 256  ;;  %p1198_p7 = scmp.lt.s32.totalorder %s1499_s12, %s1196_s16 }
  0x5b   : > { %p1193_p11 = pnand %p1191_p9, %p1177_p12  ;;  %p1199_p4 = scmp.lt.s32.totalorder %s1197_s18, %s1190_s23 }
  0x5d   : > { %p1194_p0 = pneg %p1193_p11  ;;  %p1200_p13 = por %p1199_p4, %p1198_p7 }
  0x5f   : > { %p1201_p6 = pnand %p1200_p13, %p1194_p0 }
  0x61   : > { %1204 = shalt.err (!%p1201_p6)
}
  0x62   : > { %1047 = dma.hbm_to_vmem [thread:$0]  (!%p1495_p2), %s1491_s24, 128, %s1499_s12, %s291_s19  }
  0x63   : > { %310 = sbr.rel (%p1398_p8) target bundleno = 916 (0x394), region = 48  ;;  %s1529_s21 = sand.u32 (!%p1398_p8), 1, %s1275_s25  }
  0x64   : > { %s872_s30 = sshll.u32 (!%p1398_p8), %s1529_s21, 3  ;;  %s313_s14 = scalar_lea.sflag (!%p1398_p8), [#allocation4], %s1529_s21 }
  0x65   : > { %s1533_s15 = scalar_lea.vmem (!%p1398_p8), [#allocation3], %s872_s30  ;;  %p1639_p7 = scmp.ne.s32.totalorder (!%p1398_p8), %s1632_s11, 0 }
  0x6a   : > { %1258 = dma.done.wait (%p1639_p7), %s313_s14, 128  }
  0x6b   : > { %1260 = vsyncadd (%p1639_p7), %s313_s14, 4294967168  ;;  %p1640_p2 = scmp.ne.s32.totalorder %s1630_s9, 0 }
  0x6d   : > { %1262 = dma.done.wait (%p1640_p2), [#allocation7], 10240  }
  0x6e   : > { %1264 = vsyncadd (%p1640_p2), [#allocation7], 4294957056  ;;  %v1300_v0 = vmov 0.0|0.0   ;;  %vm1301_vm0 = vmmov 0   ;;  %v1302_v1 = vmov 0.0   ;;  %v371_v2 = vld [vmem:[#allocation6] sm:$0xff] }
  0x6f   : > { %937 = vmatprep.subr.bf16.mxu0 %v1300_v0  ;;  %934 = vmatprep.mubr.msk.f32.mxu0 %vm1301_vm0, %v1302_v1  ;;  %v372_v3 = vld [vmem:[#allocation6 + $0x8] sm:$0xff]  ;;  %v373_v4 = vld [vmem:[#allocation6 + $0x10] sm:$0xff]  ;;  %v374_v6 = vld [vmem:[#allocation6 + $0x18] sm:$0xff]  ;;  %s875_s19 = sshll.u32 %s1529_s21, 5  ;;  %s884_s16 = sshll.u32 %s1283_s27, 9 }
  0x70   : > { %649 = vmatprep.mubr.f32.mxu1 %v1302_v1  ;;  %v938_v5 = vpack.c.bf16 %v372_v3, %v371_v2  ;;  %v941_v7 = vpack.c.bf16 %v374_v6, %v373_v4  ;;  %v375_v8 = vld [vmem:[#allocation6 + $0x20] sm:$0xff]  ;;  %v376_v9 = vld [vmem:[#allocation6 + $0x28] sm:$0xff]  ;;  %v377_v11 = vld [vmem:[#allocation6 + $0x30] sm:$0xff]  ;;  %s358_s18 = scalar_lea.vmem [#allocation9], %s875_s19  ;;  %s1566_s9 = scalar_lea.hbm %s1622_s7, %s884_s16 }
  0x71   : > { %v944_v10 = vpack.c.bf16 %v376_v9, %v375_v8  ;;  %v378_v12 = vld [vmem:[#allocation6 + $0x38] sm:$0xff]  ;;  %v379_v14 = vld [vmem:[#allocation6 + $0x40] sm:$0xff]  ;;  %v380_v15 = vld [vmem:[#allocation6 + $0x48] sm:$0xff]  ;;  %s748_s30 = sshll.u32 %s358_s18, 4  ;;  %s732_s27 = scalar_lea.sflag [#allocation5], %s1529_s21  ;;  %s1568_s30 = int_to_ptr.vmem [resolvable:$true] %s748_s30 }
  0x72   : > { %939 = vmatpush3.bf16.msra.mxu0 %v938_v5  ;;  %v947_v13 = vpack.c.bf16 %v378_v12, %v377_v11  ;;  %v950_v16 = vpack.c.bf16 %v380_v15, %v379_v14  ;;  %v381_v17 = vld [vmem:[#allocation6 + $0x50] sm:$0xff]  ;;  %v382_v18 = vld [vmem:[#allocation6 + $0x58] sm:$0xff]  ;;  %v383_v20 = vld [vmem:[#allocation6 + $0x60] sm:$0xff]  ;;  %s1205_s11 = scalar_lea.vmem %s1568_s30, 512  ;;  %p1641_p12 = scmp.ne.s32.totalorder %s1637_s22, 0 }
  0x73   : > { %940 = vmatprep.subr.bf16.mxu0 %v1300_v0  ;;  %v953_v19 = vpack.c.bf16 %v382_v18, %v381_v17  ;;  %v384_v21 = vld [vmem:[#allocation6 + $0x68] sm:$0xff]  ;;  %v385_v23 = vld [vmem:[#allocation6 + $0x70] sm:$0xff]  ;;  %v386_v24 = vld [vmem:[#allocation6 + $0x78] sm:$0xff]  ;;  %p1206_p8 = scmp.ne.s32.totalorder %s1568_s30, %s1205_s11  ;;  %s1303_s13 = smov [#allocation9]  }
  0x74   : > { %v956_v22 = vpack.c.bf16 %v384_v21, %v383_v20  ;;  %v959_v25 = vpack.c.bf16 %v386_v24, %v385_v23  ;;  %v370_v26 = vld [vmem:[%s1533_s15] sm:$0xff]  ;;  %v500_v36 = vld [vmem:[#allocation8 + $0x8] sm:$0xff]  ;;  %v499_v41 = vld [vmem:[#allocation8] sm:$0xff]  ;;  %s1209_s24 = sshll.u32 %s1303_s13, 4  ;;  %s1210_s24 = int_to_ptr.vmem [resolvable:$false] %s1209_s24 }
  0x75   : > { %v876_v27 = vld [vmem:[%s1617_s2] ss:$0 sm:$0xff]  ;;  %v504_v37 = vld [vmem:[#allocation8 + $0x28] sm:$0xff]  ;;  %v502_v38 = vld [vmem:[#allocation8 + $0x18] sm:$0xff]  ;;  %p1207_p1 = pnand %p1206_p8, %p1641_p12  ;;  %s1211_s12 = scalar_lea.vmem %s1210_s24, 1024 }
  0x76   : > { %942 = vmatpush3.bf16.msra.mxu0 %v941_v7  ;;  %v961_v39 = vpack.c.bf16 %v504_v37, %v500_v36  ;;  %v506_v40 = vld [vmem:[#allocation8 + $0x38] sm:$0xff]  ;;  %v503_v42 = vld [vmem:[#allocation8 + $0x20] sm:$0xff]  ;;  %v501_v45 = vld [vmem:[#allocation8 + $0x10] sm:$0xff]  ;;  %p1212_p3 = scmp.lt.s32.totalorder %s1568_s30, %s1210_s24  ;;  %p1213_p5 = scmp.lt.s32.totalorder %s1211_s12, %s1205_s11 }
  0x77   : > { %943 = vmatprep.subr.bf16.mxu0 %v1300_v0  ;;  %v993_v43 = vpack.c.bf16 %v506_v40, %v502_v38  ;;  %v963_v44 = vpack.c.bf16 %v503_v42, %v499_v41  ;;  %v505_v46 = vld [vmem:[#allocation8 + $0x30] sm:$0xff]  ;;  %v508_v47 = vld [vmem:[#allocation8 + $0x48] sm:$0xff]  ;;  %v510_v50 = vld [vmem:[#allocation8 + $0x58] sm:$0xff]  ;;  %p1208_p10 = pneg %p1207_p1 }
  0x78   : > { %962 = vmatprep.subr.bf16.mxu1 %v961_v39  ;;  %v995_v48 = vpack.c.bf16 %v505_v46, %v501_v45  ;;  %v512_v49 = vld [vmem:[#allocation8 + $0x68] sm:$0xff]  ;;  %v514_v51 = vld [vmem:[#allocation8 + $0x78] sm:$0xff]  ;;  %v507_v54 = vld [vmem:[#allocation8 + $0x40] sm:$0xff]  ;;  %p1214_p9 = por %p1213_p5, %p1212_p3 }
  0x79   : > { %964 = vmatpush1.bf16.msra.mxu1 %v963_v44  ;;  %v965_v52 = vpack.c.bf16 %v512_v49, %v508_v47  ;;  %v997_v53 = vpack.c.bf16 %v514_v51, %v510_v50  ;;  %v511_v55 = vld [vmem:[#allocation8 + $0x60] sm:$0xff]  ;;  %v509_v56 = vld [vmem:[#allocation8 + $0x50] sm:$0xff]  ;;  %v516_v59 = vld [vmem:[#allocation8 + $0x88] sm:$0xff] }
  0x7a   : > { %945 = vmatpush3.bf16.msra.mxu0 %v944_v10  ;;  %v967_v57 = vpack.c.bf16 %v511_v55, %v507_v54  ;;  %v513_v58 = vld [vmem:[#allocation8 + $0x70] sm:$0xff]  ;;  %v520_v60 = vld [vmem:[#allocation8 + $0xa8] sm:$0xff]  ;;  %v518_v63 = vld [vmem:[#allocation8 + $0x98] sm:$0xff]  ;;  %p1215_p11 = pnand %p1214_p9, %p1208_p10 }
  0x7b   : > { %946 = vmatprep.subr.bf16.mxu0 %v1300_v0  ;;  %966 = vmatprep.subr.bf16.mxu1 %v965_v52  ;;  %v999_v61 = vpack.c.bf16 %v513_v58, %v509_v56  ;;  %v969_v62 = vpack.c.bf16 %v520_v60, %v516_v59  ;;  %v519_v3 = vld [vmem:[#allocation8 + $0xa0] sm:$0xff]  ;;  %v517_v4 = vld [vmem:[#allocation8 + $0x90] sm:$0xff]  ;;  %v524_v12 = vld [vmem:[#allocation8 + $0xc8] sm:$0xff] }
  0x7c   : > { %v521_v5 = vld [vmem:[#allocation8 + $0xb0] sm:$0xff]  ;;  %v526_v14 = vld [vmem:[#allocation8 + $0xd8] sm:$0xff]  ;;  %v523_v17 = vld [vmem:[#allocation8 + $0xc0] sm:$0xff] }
  0x7d   : > { %968 = vmatpush1.bf16.msra.mxu1 %v967_v57  ;;  %v1003_v7 = vpack.c.bf16 %v521_v5, %v517_v4  ;;  %v527_v18 = vld [vmem:[#allocation8 + $0xe0] sm:$0xff]  ;;  %v525_v21 = vld [vmem:[#allocation8 + $0xd0] sm:$0xff]  ;;  %v532_v24 = vld [vmem:[#allocation8 + $0x108] sm:$0xff] }
  0x7e   : > { %948 = vmatpush3.bf16.msra.mxu0 %v947_v13  ;;  %970 = vmatprep.subr.bf16.mxu1 %v969_v62  ;;  %v528_v13 = vld [vmem:[#allocation8 + $0xe8] sm:$0xff]  ;;  %v975_v20 = vpack.c.bf16 %v527_v18, %v523_v17  ;;  %v542_v38 = vld [vmem:[#allocation8 + $0x158] sm:$0xff]  ;;  %v539_v42 = vld [vmem:[#allocation8 + $0x140] sm:$0xff]  ;;  %v565_v18 = vlaneseq }
  0x7f   : > { %949 = vmatprep.subr.bf16.mxu0 %v1300_v0  ;;  %v973_v15 = vpack.c.bf16 %v528_v13, %v524_v12  ;;  %v544_v37 = vld [vmem:[#allocation8 + $0x168] sm:$0xff]  ;;  %v546_v39 = vld [vmem:[#allocation8 + $0x178] sm:$0xff]  ;;  %v541_v44 = vld [vmem:[#allocation8 + $0x150] sm:$0xff] }
  0x80   : > { %v1013_v41 = vpack.c.bf16 %v546_v39, %v542_v38  ;;  %v545_v46 = vld [vmem:[#allocation8 + $0x170] sm:$0xff]  ;;  %v548_v47 = vld [vmem:[#allocation8 + $0x188] sm:$0xff]  ;;  %v550_v51 = vld [vmem:[#allocation8 + $0x198] sm:$0xff] }
  0x81   : > { %v1015_v49 = vpack.c.bf16 %v545_v46, %v541_v44  ;;  %v554_v52 = vld [vmem:[#allocation8 + $0x1b8] sm:$0xff]  ;;  %v551_v55 = vld [vmem:[#allocation8 + $0x1a0] sm:$0xff]  ;;  %v549_v56 = vld [vmem:[#allocation8 + $0x190] sm:$0xff] }
  0x82   : > { %951 = vmatpush3.bf16.msra.mxu0 %v950_v16  ;;  %v530_v16 = vld [vmem:[#allocation8 + $0xf8] sm:$0xff]  ;;  %v1017_v54 = vpack.c.bf16 %v554_v52, %v550_v51  ;;  %v553_v57 = vld [vmem:[#allocation8 + $0x1b0] sm:$0xff]  ;;  %v556_v59 = vld [vmem:[#allocation8 + $0x1c8] sm:$0xff] }
  0x83   : > { %952 = vmatprep.subr.bf16.mxu0 %v1300_v0  ;;  %v560_v60 = vld [vmem:[#allocation8 + $0x1e8] sm:$0xff]  ;;  %v1019_v62 = vpack.c.bf16 %v553_v57, %v549_v56  ;;  %v557_v4 = vld [vmem:[#allocation8 + $0x1d0] sm:$0xff] }
  0x84   : > { %v561_v5 = vld [vmem:[#allocation8 + $0x1f0] sm:$0xff] }
  0x85   : > { %v877_v13 = vld [vmem:[%s1618_s3] ss:$0 sm:$0xff] }
  0x86   : > { %954 = vmatpush3.bf16.msra.mxu0 %v953_v19  ;;  %v1005_v19 = vpack.c.bf16 %v530_v16, %v526_v14 }
  0x87   : > { %955 = vmatprep.subr.bf16.mxu0 %v1300_v0 }
  0x8a   : > { %957 = vmatpush3.bf16.msra.mxu0 %v956_v22  ;;  %v529_v22 = vld [vmem:[#allocation8 + $0xf0] sm:$0xff] }
  0x8b   : > { %958 = vmatprep.subr.bf16.mxu0 %v1300_v0  ;;  %v522_v0 = vld [vmem:[#allocation8 + $0xb8] sm:$0xff]  ;;  %v1007_v23 = vpack.c.bf16 %v529_v22, %v525_v21  ;;  %v563_v22 = vld [vmem:[%s1621_s6] sm:$0xf] }
  0x8c   : > { %v1001_v2 = vpack.c.bf16 %v522_v0, %v518_v63  ;;  %v989_v63 = vpack.c.bf16 %v560_v60, %v556_v59  ;;  %v562_v0 = vld [vmem:[#allocation8 + $0x1f8] sm:$0xff] }
  0x8e   : > { %960 = vmatpush3.bf16.msra.mxu0 %v959_v25  ;;  %v536_v25 = vld [vmem:[#allocation8 + $0x128] sm:$0xff] }
  0x8f   : > { %994 = vmatprep.subr.bf16.mxu0 %v993_v43  ;;  %v543_v43 = vld [vmem:[#allocation8 + $0x160] sm:$0xff] }
  0x90   : > { %v983_v45 = vpack.c.bf16 %v543_v43, %v539_v42 }
  0x91   : > { %935 = vmatmul.mubr.f32.vlgmr.msra.gmra.mrb[0].mxu0 %v370_v26  ;;  %v534_v26 = vld [vmem:[#allocation8 + $0x118] sm:$0xff] }
  0x92   : > { %720 = vmatprep.mubr.f32.mxu0 %v1302_v1  ;;  %996 = vmatpush1.bf16.msra.mxu0 %v995_v48  ;;  %v515_v1 = vld [vmem:[#allocation8 + $0x80] sm:$0xff]  ;;  %v552_v48 = vld [vmem:[#allocation8 + $0x1a8] sm:$0xff] }
  0x93   : > { %998 = vmatprep.subr.bf16.mxu0 %v997_v53  ;;  %v971_v6 = vpack.c.bf16 %v519_v3, %v515_v1  ;;  %v985_v50 = vpack.c.bf16 %v552_v48, %v548_v47  ;;  %v547_v53 = vld [vmem:[#allocation8 + $0x180] sm:$0xff] }
  0x94   : > { %v987_v58 = vpack.c.bf16 %v551_v55, %v547_v53  ;;  %v555_v1 = vld [vmem:[#allocation8 + $0x1c0] sm:$0xff] }
  0x95   : > { %972 = vmatpush1.bf16.msra.mxu1 %v971_v6 }
  0x96   : > { %1000 = vmatpush1.bf16.msra.mxu0 %v999_v61  ;;  %974 = vmatprep.subr.bf16.mxu1 %v973_v15  ;;  %v558_v61 = vld [vmem:[#allocation8 + $0x1d8] sm:$0xff]  ;;  %v878_v15 = vld [vmem:[%s1619_s4] ss:$0 sm:$0xff] }
  0x97   : > { %1002 = vmatprep.subr.bf16.mxu0 %v1001_v2  ;;  %v559_v2 = vld [vmem:[#allocation8 + $0x1e0] sm:$0xff]  ;;  %v1021_v3 = vpack.c.bf16 %v562_v0, %v558_v61 }
  0x98   : > { %v991_v6 = vpack.c.bf16 %v559_v2, %v555_v1 }
  0x99   : > { %976 = vmatpush1.bf16.msra.mxu1 %v975_v20 }
  0x9a   : > { %1004 = vmatpush1.bf16.msra.mxu0 %v1003_v7  ;;  %v1023_v7 = vpack.c.bf16 %v561_v5, %v557_v4 }
  0x9b   : > { %1006 = vmatprep.subr.bf16.mxu0 %v1005_v19  ;;  %v566_v19 = vshrl.u32 %v565_v18, 7 }
  0x9d   : > { %v567_v20 = vsub.s32 0, %v566_v19  ;;  %v575_v21 = vsub.s32 2, %v566_v19 }
  0x9e   : > { %1008 = vmatpush1.bf16.msra.mxu0 %v1007_v23  ;;  %v571_v23 = vsub.s32 1, %v566_v19 }
 0x164   : > { %v460_v28 = vpop.f32.mrb[0].mxu0 }
 0x165   : > { %v461_v29 = vadd.f32 %v876_v27, %v460_v28  ;;  %v936_v30 = vpop.f32.mrb[1].mxu0  ;;  %v977_v27 = vpack.c.bf16 %v536_v25, %v532_v24  ;;  %v538_v28 = vld [vmem:[#allocation8 + $0x138] sm:$0xff]  ;;  %v568_v24 = vrot.slane %v563_v22, %v567_v20  ;;  %v576_v25 = vrot.slane %v563_v22, %v575_v21 }
 0x166   : > { %v535_v30 = vld [vmem:[#allocation8 + $0x120] sm:$0xff] }
 0x167   : > { %v465_v31 = vmul.f32 0.70710677, %v461_v29  ;;  %v464_v33 = vmul.f32 0.5, %v461_v29  ;;  %v531_v29 = vld [vmem:[#allocation8 + $0x100] sm:$0xff]  ;;  %978 = vmatprep.subr.bf16.mxu1 %v977_v27 }
 0x169   : > { %1115 = verf.f32 %v465_v31  ;;  %v1009_v31 = vpack.c.bf16 %v538_v28, %v534_v26  ;;  %v572_v26 = vrot.slane %v563_v22, %v571_v23 }
 0x16b   : > { %1010 = vmatprep.subr.bf16.mxu0 %v1009_v31 }
 0x173   : > { %v1116_v32 = vpop.eup %1115 }
 0x174   : > { %v467_v34 = vadd.f32 1.0, %v1116_v32  ;;  %v979_v32 = vpack.c.bf16 %v535_v30, %v531_v29 }
 0x176   : > { %v468_v35 = vmul.f32 %v467_v34, %v464_v33  ;;  %v533_v33 = vld [vmem:[#allocation8 + $0x110] sm:$0xff]  ;;  %980 = vmatpush1.bf16.msra.mxu1 %v979_v32 }
 0x177   : > { %v537_v34 = vld [vmem:[#allocation8 + $0x130] sm:$0xff] }
 0x178   : > { %469 = vadd.xlane.f32.xlu0 %v468_v35  ;;  %v1011_v36 = vpack.c.bf16 %v537_v34, %v533_v33 }
 0x17a   : > { %1012 = vmatpush1.bf16.msra.mxu0 %v1011_v36 }
 0x17b   : > { %1014 = vmatprep.subr.bf16.mxu0 %v1013_v41 }
 0x17e   : > { %1016 = vmatpush1.bf16.msra.mxu0 %v1015_v49 }
 0x17f   : > { %1018 = vmatprep.subr.bf16.mxu0 %v1017_v54 }
 0x182   : > { %1020 = vmatpush1.bf16.msra.mxu0 %v1019_v62 }
 0x183   : > { %1022 = vmatprep.subr.bf16.mxu0 %v1021_v3 }
 0x186   : > { %1024 = vmatpush1.bf16.msra.mxu0 %v1023_v7 }
 0x205   : > { %v470_v8 = vpop.xlane.xlu0 %469 }
 0x206   : > { %v472_v9 = vmul.f32 0.0078125, %v470_v8 }
 0x208   : > { %v1547_v10 = vsub.f32 %v468_v35, %v472_v9  ;;  %v540_v35 = vld [vmem:[#allocation8 + $0x148] sm:$0xff] }
 0x209   : > { %v981_v40 = vpack.c.bf16 %v544_v37, %v540_v35 }
 0x20a   : > { %v474_v11 = vmul.f32 %v1547_v10, %v1547_v10 }
 0x20b   : > { %982 = vmatprep.subr.bf16.mxu1 %v981_v40 }
 0x20c   : > { %475 = vadd.xlane.f32.xlu0 %v474_v11  ;;  %984 = vmatpush1.bf16.msra.mxu1 %v983_v45 }
 0x20d   : > { %986 = vmatprep.subr.bf16.mxu1 %v985_v50 }
 0x210   : > { %988 = vmatpush1.bf16.msra.mxu1 %v987_v58 }
 0x211   : > { %990 = vmatprep.subr.bf16.mxu1 %v989_v63 }
 0x214   : > { %992 = vmatpush1.bf16.msra.mxu1 %v991_v6 }
 0x299   : > { %v476_v8 = vpop.xlane.xlu0 %475 }
 0x29a   : > { %v477_v9 = vmul.f32 0.0078125, %v476_v8 }
 0x29c   : > { %v478_v11 = vadd.f32 1e-12, %v477_v9 }
 0x29e   : > { %1117 = vrsqrt.f32 %v478_v11 }
 0x2a8   : > { %v1118_v12 = vpop.eup %1117 }
 0x2a9   : > { %v480_v14 = vmul.f32 %v1118_v12, %v1547_v10  ;;  %v579_v10 = vsub.s32 3, %v566_v19 }
 0x2ab   : > { %v488_v16 = vmul.f32 %v877_v13, %v480_v14  ;;  %v580_v27 = vrot.slane %v563_v22, %v579_v10 }
 0x2ad   : > { %v496_v17 = vadd.f32 %v878_v15, %v488_v16 }
 0x2af   : > { %650 = vmatmul.mubr.f32.vlgmr.msra.gmra.mrb[0].mxu1 %v496_v17  ;;  %721 = vmatmul.mubr.f32.vlgmr.msra.gmra.mrb[2].mxu0 %v496_v17 }
 0x382   : > { %v651_v28 = vpop.f32.mrb[0].mxu1  ;;  %v722_v29 = vpop.f32.mrb[2].mxu0 }
 0x383   : > { %v652_v30 = vadd.f32 %v651_v28, %v568_v24  ;;  %v723_v31 = vadd.f32 %v722_v29, %v576_v25  ;;  %v653_v32 = vpop.f32.mrb[1].mxu1  ;;  %v724_v33 = vpop.f32.mrb[3].mxu0 }
 0x384   : > { %v654_v34 = vadd.f32 %v653_v32, %v572_v26  ;;  %v725_v35 = vadd.f32 %v724_v33, %v580_v27 }
 0x385   : > { %727 = vst [vmem:[%s358_s18] sm:$0xff] %v652_v30  ;;  %729 = vst [vmem:[%s358_s18 + $0x10] sm:$0xff] %v723_v31 }
 0x386   : > { %728 = vst [vmem:[%s358_s18 + $0x8] sm:$0xff] %v654_v34  ;;  %730 = vst [vmem:[%s358_s18 + $0x18] sm:$0xff] %v725_v35 }
 0x387   : > { %1218 = shalt.err (!%p1215_p11)
}
 0x388   : > { %s1219_s21 = scalar_lea.hbm %s1566_s9, 512  ;;  %s1223_s23 = scalar_lea.hbm %s1622_s7, 1024 }
 0x389   : > { %p1220_p0 = scmp.ne.s32.totalorder %s1566_s9, %s1219_s21  ;;  %p1224_p6 = scmp.lt.u32.totalorder %s1566_s9, %s1622_s7 }
 0x38a   : > { %p1225_p7 = scmp.lt.u32.totalorder %s1223_s23, %s1219_s21  ;;  %p1227_p8 = scmp.lt.u32.totalorder %s1219_s21, %s1566_s9 }
 0x38b   : > { %p1221_p4 = pnand %p1220_p0, %p1641_p12 }
 0x38c   : > { %p1226_p2 = por %p1225_p7, %p1224_p6 }
 0x38d   : > { %p1222_p13 = pneg %p1221_p4 }
 0x38e   : > { %p1228_p1 = por %p1227_p8, %p1226_p2 }
 0x390   : > { %p1229_p10 = pnand %p1228_p1, %p1222_p13 }
 0x392   : > { %1232 = shalt.err (!%p1229_p10)
}
 0x393   : > { %1035 = dma.vmem_to_hbm [thread:$0]  (%p1641_p12), %s1568_s30, 512, %s1566_s9, %s732_s27  }
 0x394 PF: > { %s1642_s18 = sld [smem:[#allocation13_spill]]  ;;  %s1643_s14 = sld [smem:[#allocation14_spill]] }
 0x395   : > { %p1645_p5 = scmp.ge.s32.totalorder %s1291_s29, 2 }
 0x39a   : > { %s760_s15 = sand.u32 1, %s1642_s18   ;;  %p1644_p3 = scmp.ne.s32.totalorder %s1643_s14, 0 }
 0x39b   : > { %s761_s11 = scalar_lea.sflag [#allocation5], %s760_s15 }
 0x39c   : > { %p1049_p9 = pnand %p1645_p5, %p1644_p3 }
 0x39e   : > { %1266 = dma.done.wait (!%p1049_p9), %s761_s11, 512  }
 0x39f   : > { %1268 = vsyncadd (!%p1049_p9), %s761_s11, 4294966784  ;;  %s24_s29 = sadd.s32 1, %s1291_s29   ;;  %s1646_s24 = smov %s1275_s25 }
 0x3a0   : > { %p21_p11 = scmp.ge.s32.totalorder %s24_s29, 4   ;;  %s1647_s25 = smov %s1279_s26 }
 0x3a1   : > { %s1648_s26 = smov %s1486_s8  ;;  %s1649_s27 = smov %s1287_s28 }
 0x3a2   : > { %s1650_s28 = smov %s1652_s20  ;;  %23 = sbr.rel (!%p21_p11) target bundleno = 7 (0x7), region = 109 }
 0x3a9   :  { %766 = vsyncpa [#allocation4], 1 }
 0x3aa   :  { %768 = vsyncpa [#allocation4 + $0x1], 1 }
 0x3ab   :  { %769 = vsyncpa [#allocation7], 1 }
 0x3ac   :  { %770 = vsyncpa [#allocation5], 1 }
 0x3ad   :  { %772 = vsyncpa [#allocation5 + $0x1], 1 }

</bundles_post_ra>
